<compile_context>
chip_gen: v5e
topology: v5e:2x2
jax: 0.10.0
libtpu: 0.0.40
codegen_flags: <defaults>
</compile_context>

<pallas_src>
import jax
import jax.numpy as jnp
from jax.experimental import pallas as pl
from jax.experimental.pallas import tpu as pltpu


def _round_up(x, m):
    return ((x + m - 1) // m) * m


def _cdiv(a, b):
    return (a + b - 1) // b


def _conv1d_deriv_kernel(w_ref, x_ref, o_ref):
    """w_ref: SMEM (K,) f32 taps already scaled by 1/resol.
    x_ref: VMEM (tile_n, L) f32.  o_ref: VMEM (tile_n, L_out) f32."""
    K = w_ref.shape[0]
    L_out = o_ref.shape[-1]
    # Single VMEM slab read; the shifted taps below are in-register lane
    # slices of this value (lowered to XLU rotates), not extra VMEM passes.
    x = x_ref[...]
    acc = w_ref[0] * x[:, 0:L_out]
    for k in range(1, K):
        acc = acc + w_ref[k] * x[:, k:k + L_out]
    o_ref[...] = acc


def conv1d_derivative(x, der_filter, resol, *, target_tile_bytes=10 << 20):
    """x: (N, 1, L) f32, der_filter: (1, 1, K) f32, resol: python float.
    Returns (N, 1, L - K + 1) f32, matching Conv1dDerivative.forward."""
    N, C, L = x.shape
    assert C == 1, "Conv1dDerivative uses a single input channel"
    K = der_filter.shape[-1]
    L_out = L - K + 1
    assert L_out >= 1

    # ---- row tiling: bounded waste, balanced tiles, >=2 grid steps ----
    bytes_per_row = (L + L_out) * 4                       # in + out, f32
    tile_n_max = max(8, (target_tile_bytes // bytes_per_row) // 8 * 8)
    if N < 8:
        # Full-dim row block (legal without 8-row divisibility); single step.
        tile_n = N
    else:
        rows = _round_up(N, 8)
        num_tiles = _cdiv(rows, tile_n_max)
        if num_tiles == 1 and rows >= 16:
            num_tiles = 2          # keep both v7x TensorCores busy
        tile_n = _round_up(_cdiv(rows, num_tiles), 8)
    grid = (_cdiv(N, tile_n),)
    # TODO(synk): for very long signals where even 8 rows of L overflow the
    # VMEM budget, add an L-tiled variant with a K-1 element halo.

    x2d = x.reshape(N, L).astype(jnp.float32)
    # Fold 1/resol into the taps (free on host; removes a VPU pass in-kernel).
    w = der_filter.reshape(K).astype(jnp.float32) / jnp.float32(resol)

    out2d = pl.pallas_call(
        _conv1d_deriv_kernel,
        out_shape=jax.ShapeDtypeStruct((N, L_out), jnp.float32),
        grid_spec=pltpu.PrefetchScalarGridSpec(
            num_scalar_prefetch=0,
            grid=grid,
            in_specs=[
                # Filter taps: tiny, whole array in SMEM every step.
                pl.BlockSpec(memory_space=pltpu.MemorySpace.SMEM),
                # Input rows, full (unpadded) length per tile.
                pl.BlockSpec((tile_n, L), lambda i: (i, 0)),
            ],
            out_specs=pl.BlockSpec((tile_n, L_out), lambda i: (i, 0)),
        ),
        compiler_params=pltpu.CompilerParams(
            dimension_semantics=("parallel",),
            vmem_limit_bytes=32 << 20,
        ),
    )(w, x2d)

    return out2d.reshape(N, 1, L_out)


def _reference(x, der_filter, resol):
    N, _, L = x.shape
    w = der_filter.reshape(-1)
    K = w.shape[0]
    L_out = L - K + 1
    x2d = x.reshape(N, L)
    out = sum(w[k] * x2d[:, k:k + L_out] for k in range(K)) / resol
    return out.reshape(N, 1, L_out)


if __name__ == "__main__":
    key = jax.random.PRNGKey(0)
    k1, k2 = jax.random.split(key)

    # Deterministic parameters matching __init__: DerFilter shape (1, 1, 3),
    # central-difference stencil; resol = 2*dt as used upstream.
    der_filter = jnp.array([[[-1.0, 0.0, 1.0]]], dtype=jnp.float32)
    dt = 0.00025
    resol = 2.0 * dt

    # (a) Small shape consistent with the module: batch=2, 1 channel, len=16.
    x_small = jax.random.normal(k1, (2, 1, 16), dtype=jnp.float32)
    out_small = conv1d_derivative(x_small, der_filter, resol)
    jax.block_until_ready(out_small)
    ref_small = _reference(x_small, der_filter, resol)
    assert out_small.shape == ref_small.shape
    assert jnp.allclose(out_small, ref_small, rtol=1e-5, atol=1e-4), \
        "mismatch vs reference (small)"

    # (b) Non-multiple-of-8 batch + longer row: exercises the balanced
    #     multi-step grid and the masked partial last row-tile.
    x_big = jax.random.normal(k2, (10, 1, 256), dtype=jnp.float32)
    out_big = conv1d_derivative(x_big, der_filter, resol)
    jax.block_until_ready(out_big)
    ref_big = _reference(x_big, der_filter, resol)
    assert out_big.shape == ref_big.shape
    assert jnp.allclose(out_big, ref_big, rtol=1e-5, atol=1e-4), \
        "mismatch vs reference (big)"

    print("KERNEL_OK")
</pallas_src>

<mosaic_0001>
module attributes {stable_mosaic.version = 11 : i64} {
  func.func @_conv1d_deriv_kernel(%arg0: i32, %arg1: memref<3xf32, #tpu.memory_space<smem>>, %arg2: memref<2x16xf32, #tpu.memory_space<vmem>>, %arg3: memref<2x14xf32, #tpu.memory_space<vmem>>) attributes {dimension_semantics = [#tpu.dimension_semantics<parallel>], iteration_bounds = array<i64: 1>, scalar_prefetch = 0 : i64, scratch_operands = 0 : i64, tpu.core_type = #tpu.core_type<tc>, window_params = [{transform_indices = @transform_0, window_bounds = array<i64: 3>}, {transform_indices = @transform_1, window_bounds = array<i64: 2, 16>}, {transform_indices = @transform_2, window_bounds = array<i64: 2, 14>}]} {
    %c0 = arith.constant 0 : index
    %c0_0 = arith.constant 0 : index
    %0 = vector.load %arg2[%c0, %c0_0] : memref<2x16xf32, #tpu.memory_space<vmem>>, vector<2x16xf32>
    %c0_1 = arith.constant 0 : index
    %1 = memref.load %arg1[%c0_1] : memref<3xf32, #tpu.memory_space<smem>>
    %2 = vector.extract_strided_slice %0 {offsets = [0, 0], sizes = [2, 14], strides = [1, 1]} : vector<2x16xf32> to vector<2x14xf32>
    %3 = vector.broadcast %1 : f32 to vector<2x14xf32>
    %4 = arith.mulf %3, %2 : vector<2x14xf32>
    %c1 = arith.constant 1 : index
    %5 = memref.load %arg1[%c1] : memref<3xf32, #tpu.memory_space<smem>>
    %6 = vector.extract_strided_slice %0 {offsets = [0, 1], sizes = [2, 14], strides = [1, 1]} : vector<2x16xf32> to vector<2x14xf32>
    %7 = vector.broadcast %5 : f32 to vector<2x14xf32>
    %8 = arith.mulf %7, %6 : vector<2x14xf32>
    %9 = arith.addf %4, %8 : vector<2x14xf32>
    %c2 = arith.constant 2 : index
    %10 = memref.load %arg1[%c2] : memref<3xf32, #tpu.memory_space<smem>>
    %11 = vector.extract_strided_slice %0 {offsets = [0, 2], sizes = [2, 14], strides = [1, 1]} : vector<2x16xf32> to vector<2x14xf32>
    %12 = vector.broadcast %10 : f32 to vector<2x14xf32>
    %13 = arith.mulf %12, %11 : vector<2x14xf32>
    %14 = arith.addf %9, %13 : vector<2x14xf32>
    %c0_2 = arith.constant 0 : index
    %c0_3 = arith.constant 0 : index
    %15 = vector.load %arg3[%c0_2, %c0_3] : memref<2x14xf32, #tpu.memory_space<vmem>>, vector<2x14xf32>
    tpu.vector_store %arg3[%c0_2, %c0_3], %14 {strides = array<i32>} : memref<2x14xf32, #tpu.memory_space<vmem>>, vector<2x14xf32>,
    return
  }
  func.func @transform_0(%arg0: i32) -> i32 {
    %c0_i32 = arith.constant 0 : i32
    %c0_i32_0 = arith.constant 0 : i32
    return %c0_i32 : i32
  }
  func.func @transform_1(%arg0: i32) -> (i32, i32) {
    %c0_i32 = arith.constant 0 : i32
    %c0_i32_0 = arith.constant 0 : i32
    return %arg0, %c0_i32 : i32, i32
  }
  func.func @transform_2(%arg0: i32) -> (i32, i32) {
    %c0_i32 = arith.constant 0 : i32
    %c0_i32_0 = arith.constant 0 : i32
    return %arg0, %c0_i32 : i32, i32
  }
}

</mosaic_0001>

<bundles_post_ra>
// kernel: tpu_custom_call.1
= control target key start
LH: loop header
LB: loop body
LE: loop exit
PB: predicated region body
PF: predicated region fallthrough
CT: control target
= control target key end

     0   :  { %7 = vsyncpa [#allocation5], 0  ;;  %s181_s0 = inlined_call_operand.hbm [shape: f32[3], index: 0, kind: input, shape index: {}]   ;;  %s182_s1 = inlined_call_operand.hbm [shape: f32[2,16], index: 1, kind: input, shape index: {}]   ;;  %s183_s2 = inlined_call_operand.hbm [shape: f32[2,14], index: 2, kind: output, shape index: {}]  }
   0x1   :  { %8 = vsyncpa [#allocation3], 0 }
   0x2   :  { %9 = vsyncpa [#allocation4], 0  ;;  %s15_s11 = sshll.u32 %s181_s0, 4  ;;  %s24_s14 = sshll.u32 %s182_s1, 4  ;;  %s16_s11 = int_to_ptr.hbm [resolvable:$true] %s15_s11  ;;  %s25_s14 = int_to_ptr.hbm [resolvable:$true] %s24_s14 }
   0x3   :  { %s152_s15 = smov [#allocation2]   ;;  %s153_s16 = smov [#allocation6]  }
   0x4   :  { %18 = dma.hbm_to_smem %s16_s11, 16, %s152_s15, [#allocation5]  }
   0x5   :  { %s26_s17 = sshll.u32 %s153_s16, 4  ;;  %s27_s17 = int_to_ptr.vmem [resolvable:$true] %s26_s17 }
   0x6   :  { %29 = dma.hbm_to_vmem [thread:$0]  %s25_s14, 32, %s27_s17, [#allocation3]  }
   0x7   :  { %146 = dma.done.wait [#allocation5], 16  }
   0x8   :  { %147 = vsyncadd [#allocation5], 4294967280 }
   0x9   :  { %148 = dma.done.wait [#allocation3], 32  }
   0xa   :  { %149 = vsyncadd [#allocation3], 4294967264 }
   0xb   :  { %38 = sfence }
   0xc   :  { %s79_s18 = sld [smem:[#allocation2 + $0x1]]  ;;  %v39_v0 = vld [vmem:[#allocation6] sm:$0x3]  ;;  %s154_s0 = smov 127   ;;  %vm59_vm0 = vcmask 107520  }
   0xd   :  { %s80_s19 = sld [smem:[#allocation2 + $0x2]]  ;;  %s155_s1 = smov 126  }
   0xe   :  { %s40_s20 = sld [smem:[#allocation2]]  ;;  %s156_s21 = smov [#allocation7]  }
   0xf   :  { %s66_s22 = sshll.u32 %s156_s21, 4  ;;  %s68_s25 = sshll.u32 %s183_s2, 4  ;;  %s67_s22 = int_to_ptr.vmem [resolvable:$true] %s66_s22  ;;  %s69_s25 = int_to_ptr.hbm [resolvable:$true] %s68_s25 }
  0x12   :  { %v44_v1 = vstv %s79_s18 }
  0x13   :  { %v45_v2 = vmul.f32 %v44_v1, %v39_v0  ;;  %v52_v3 = vstv %s80_s19 }
  0x14   :  { %v53_v4 = vmul.f32 %v52_v3, %v39_v0  ;;  %v41_v5 = vstv %s40_s20 }
  0x15   :  { %47 = vrot.lane.b32.xlu0 %v45_v2, %s154_s0  ;;  %v42_v7 = vmul.f32 %v41_v5, %v39_v0 }
  0x1d   :  { %55 = vrot.lane.b32.xlu0 %v53_v4, %s155_s1 }
  0x87   :  { %v48_v6 = vpop.permute.xlu0 %47 }
  0x88   :  { %v50_v8 = vadd.f32 %v48_v6, %v42_v7 }
  0x8f   :  { %v56_v9 = vpop.permute.xlu0 %55 }
  0x90   :  { %v58_v10 = vadd.f32 %v56_v9, %v50_v8 }
  0x92   :  { %60 = vst.msk [vmem:[#allocation7] sm:$0x3] %vm59_vm0, %v58_v10 }
  0x93   :  { %71 = dma.vmem_to_hbm [thread:$0]  %s67_s22, 32, %s69_s25, [#allocation4]  }
  0x94   :  { %150 = dma.done.wait [#allocation4], 32  }
  0x95   :  { %151 = vsyncadd [#allocation4], 4294967264 }
  0x96   :  { %76 = vsyncpa [#allocation3], 1 }
  0x97   :  { %77 = vsyncpa [#allocation4], 1 }
  0x98   :  { %78 = vsyncpa [#allocation5], 1 }

</bundles_post_ra>
